<compile_context>
chip_gen: v7x
topology: tpu7x:2x2x1
jax: 0.10.0
libtpu: 0.0.40
codegen_flags: <defaults>
</compile_context>

<pallas_src>
import functools

import jax
import jax.numpy as jnp
from jax.experimental import pallas as pl
from jax.experimental.pallas import tpu as pltpu


def _depth_kernel(scale_ref, w_ref, x_ref, o_ref, *, bs):
    """One grid step = `bs` samples x one THW spatial tile.

    scale_ref: SMEM (BN,)         per-sample exp(bias) * focal / equal_focal
    w_ref    : VMEM (1, C)        1x1 conv weight (resident across the grid)
    x_ref    : VMEM (bs, C, THW)  feature tile, native dtype
    o_ref    : VMEM (bs, 1, THW)  f32 depth tile
    """
    i = pl.program_id(0)
    w = w_ref[...]
    for b in range(bs):  # static unroll, bs <= 8
        # 1x1 conv over channels == (1,C) x (C,THW) matmul on the MXU, f32 accum.
        logits = jnp.dot(w, x_ref[b], preferred_element_type=jnp.float32)  # (1, THW)
        s = scale_ref[i * bs + b]
        o_ref[b] = (jnp.exp(logits) * s).astype(o_ref.dtype)


@functools.partial(jax.jit, static_argnames=("bs", "thw"))
def _depth_layer_call(weight, scale, x, *, bs, thw):
    """x: (BN, C, HW) native dtype -> (BN, 1, HW) float32."""
    BN, C, HW = x.shape
    grid = (BN // bs, HW // thw)
    itemsize = jnp.dtype(x.dtype).itemsize
    cost = pl.CostEstimate(
        flops=2 * BN * C * HW,
        transcendentals=BN * HW,
        bytes_accessed=BN * C * HW * itemsize + BN * HW * 4 + C * itemsize + BN * 4,
    )
    return pl.pallas_call(
        functools.partial(_depth_kernel, bs=bs),
        out_shape=jax.ShapeDtypeStruct((BN, 1, HW), jnp.float32),
        grid_spec=pltpu.PrefetchScalarGridSpec(
            num_scalar_prefetch=1,  # scale (BN,) -> SMEM
            grid=grid,
            in_specs=[
                pl.BlockSpec((1, C), lambda i, j, s: (0, 0)),            # weight, resident
                pl.BlockSpec((bs, C, thw), lambda i, j, s: (i, 0, j)),   # feature tile
            ],
            out_specs=pl.BlockSpec((bs, 1, thw), lambda i, j, s: (i, 0, j)),
        ),
        compiler_params=pltpu.CompilerParams(
            dimension_semantics=("parallel", "parallel")),
        cost_estimate=cost,
    )(scale, weight, x)


def _largest_divisor_leq(n, cap):
    for d in range(min(n, cap), 0, -1):
        if n % d == 0:
            return d
    return 1


def _pick_tiles(bn, c, hw, itemsize, target_bytes=2 << 20, max_bs=8):
    """Choose (samples-per-block, HW-tile) so each x block is ~target_bytes."""
    bs = _largest_divisor_leq(bn, max_bs)
    if hw % 128 == 0:
        budget_lanes = max(128, (target_bytes // max(1, bs * c * itemsize)) // 128 * 128)
        thw = 128
        for t in range(128, min(hw, budget_lanes) + 1, 128):
            if hw % t == 0:
                thw = t
    else:
        # TODO(synk): pad a ragged H*W up to a multiple of 128 instead of taking the full row.
        thw = hw
        while bs > 1 and bs * c * thw * itemsize > 4 * target_bytes:
            bs = _largest_divisor_leq(bn, bs - 1)
    return bs, thw


class DenseDepthNet:
    """JAX/Pallas port of DenseDepthNet.forward (inference path, no gt_depths)."""

    def __init__(self, embed_dims=256, num_depth_layers=1, equal_focal=100,
                 max_depth=60, loss_weight=1.0, key=None):
        self.embed_dims = embed_dims
        self.num_depth_layers = num_depth_layers
        self.equal_focal = float(equal_focal)
        self.max_depth = max_depth
        self.loss_weight = loss_weight
        if key is None:
            key = jax.random.PRNGKey(0)
        self.weights = []   # each: (1, embed_dims) == Conv2d(embed, 1, 1) weight
        self.biases = []    # each: (1,)
        for _ in range(num_depth_layers):
            key, wk, bk = jax.random.split(key, 3)
            bound = 1.0 / (embed_dims ** 0.5)
            self.weights.append(
                jax.random.uniform(wk, (1, embed_dims), jnp.float32, -bound, bound))
            self.biases.append(
                jax.random.uniform(bk, (1,), jnp.float32, -bound, bound))

    def forward(self, feature_maps, focal=None):
        # feature_maps: list of (B, N, C, H, W) arrays (any float dtype)
        depths = []
        for i, feat in enumerate(feature_maps[: self.num_depth_layers]):
            B, N, C, H, W = feat.shape
            BN, HW = B * N, H * W
            x = feat.reshape(BN, C, HW)                 # native dtype; no f32 upcast
            w = self.weights[i].astype(x.dtype)         # (1, C), tiny cast
            if focal is None:
                f = jnp.ones((BN,), jnp.float32)        # equal_focal / equal_focal
            else:
                f = focal.reshape(-1).astype(jnp.float32) / self.equal_focal
            # fold conv bias into the per-sample scale: exp(x+b)*f == exp(x)*(exp(b)*f)
            scale = jnp.exp(self.biases[i]).astype(jnp.float32)[0] * f   # (BN,)
            bs, thw = _pick_tiles(BN, C, HW, jnp.dtype(x.dtype).itemsize)
            out = _depth_layer_call(w, scale, x, bs=bs, thw=thw)         # (BN, 1, HW) f32
            depths.append(out.reshape(BN, 1, H, W))
        # TODO(synk): the optional loss() branch (masked L1 vs gt_depths) is not ported;
        # only the forward inference path is implemented in the kernel.
        return depths


def _reference_forward(net, feature_maps, focal=None):
    """Plain-JAX reference matching the PyTorch semantics (f32 conv)."""
    depths = []
    for i, feat in enumerate(feature_maps[: net.num_depth_layers]):
        B, N, C, H, W = feat.shape
        x = feat.astype(jnp.float32).reshape(B * N, C, H * W)
        w = net.weights[i]                      # (1, C)
        b = net.biases[i]                       # (1,)
        d = jnp.exp(jnp.einsum("oc,bcp->bop", w, x) + b[None, :, None])
        if focal is None:
            factor = jnp.ones((B * N,), jnp.float32)
        else:
            factor = focal.reshape(-1).astype(jnp.float32) / net.equal_focal
        d = d * factor[:, None, None]
        depths.append(d.reshape(B * N, 1, H, W))
    return depths


if __name__ == "__main__":
    key = jax.random.PRNGKey(0)
    kf, kx, kfoc = jax.random.split(key, 3)

    # Small shapes: batch=2, cameras=2, embed_dims=32, spatial 16x16.
    B, N, C, H, W = 2, 2, 32, 16, 16
    feat = jax.random.normal(kx, (B, N, C, H, W), jnp.float32) * 0.1
    focal = 100.0 + 10.0 * jax.random.normal(kfoc, (B, N), jnp.float32)

    net = DenseDepthNet(embed_dims=C, num_depth_layers=1, equal_focal=100,
                        max_depth=60, loss_weight=1.0, key=kf)

    # f32 feature path.
    depths = net.forward([feat], focal=focal)
    depths = [jax.block_until_ready(d) for d in depths]
    ref = _reference_forward(net, [feat], focal=focal)
    for d, r in zip(depths, ref):
        assert d.shape == r.shape == (B * N, 1, H, W)
        err = float(jnp.max(jnp.abs(d - r)))
        assert jnp.allclose(d, r, rtol=1e-5, atol=1e-5), err

    # bf16 feature path (no wrapper upcast; MXU accumulates in f32).
    depths_bf16 = net.forward([feat.astype(jnp.bfloat16)], focal=focal)
    jax.block_until_ready(depths_bf16[0])
    err_bf16 = float(jnp.max(jnp.abs(depths_bf16[0] - ref[0])))
    assert jnp.allclose(depths_bf16[0], ref[0], rtol=2e-2, atol=2e-2), err_bf16

    # focal=None path (factor == 1).
    depths_nofocal = net.forward([feat], focal=None)
    jax.block_until_ready(depths_nofocal[0])
    ref_nofocal = _reference_forward(net, [feat], focal=None)
    assert jnp.allclose(depths_nofocal[0], ref_nofocal[0], rtol=1e-5, atol=1e-5)

    print("KERNEL_OK")
</pallas_src>

<mosaic_0001>
module attributes {stable_mosaic.version = 11 : i64} {
  func.func @_depth_kernel(%arg0: i32, %arg1: i32, %arg2: memref<4xf32, #tpu.memory_space<smem>>, %arg3: memref<1x32xf32, #tpu.memory_space<vmem>>, %arg4: memref<4x32x256xf32, #tpu.memory_space<vmem>>, %arg5: memref<4x1x256xf32, #tpu.memory_space<vmem>>) attributes {dimension_semantics = [#tpu.dimension_semantics<parallel>, #tpu.dimension_semantics<parallel>], iteration_bounds = array<i64: 1, 1>, scalar_prefetch = 1 : i64, scratch_operands = 0 : i64, tpu.core_type = #tpu.core_type<tc>, window_params = [{pipeline_mode = #tpu.pipeline_mode<synchronous>, transform_indices = @transform_0, window_bounds = array<i64: 1, 32>}, {transform_indices = @transform_1, window_bounds = array<i64: 4, 32, 256>}, {transform_indices = @transform_2, window_bounds = array<i64: 4, 1, 256>}]} {
    %c0 = arith.constant 0 : index
    %c0_0 = arith.constant 0 : index
    %0 = vector.load %arg3[%c0, %c0_0] : memref<1x32xf32, #tpu.memory_space<vmem>>, vector<1x32xf32>
    %c0_1 = arith.constant 0 : index
    %c0_2 = arith.constant 0 : index
    %c0_3 = arith.constant 0 : index
    %1 = vector.load %arg4[%c0_1, %c0_2, %c0_3] : memref<4x32x256xf32, #tpu.memory_space<vmem>>, vector<1x32x256xf32>
    %2 = vector.shape_cast %1 : vector<1x32x256xf32> to vector<32x256xf32>
    %cst = arith.constant dense<0.000000e+00> : vector<1x256xf32>
    %3 = tpu.matmul %0, %2, %cst {dimension_numbers = #tpu.dot_dimension_numbers<[1], [0], [0], [1], [0, 0, 1, 1], [], []>} : vector<1x32xf32>, vector<32x256xf32>, vector<1x256xf32> -> vector<1x256xf32>
    %c4_i32 = arith.constant 4 : i32
    %4 = arith.muli %arg0, %c4_i32 : i32
    %c0_i32 = arith.constant 0 : i32
    %5 = arith.addi %4, %c0_i32 : i32
    %6 = arith.index_cast %5 : i32 to index
    %7 = memref.load %arg2[%6] : memref<4xf32, #tpu.memory_space<smem>>
    %8 = math.exp %3 : vector<1x256xf32>
    %9 = vector.broadcast %7 : f32 to vector<1x256xf32>
    %10 = arith.mulf %8, %9 : vector<1x256xf32>
    %c0_4 = arith.constant 0 : index
    %c0_5 = arith.constant 0 : index
    %c0_6 = arith.constant 0 : index
    %11 = vector.load %arg5[%c0_4, %c0_5, %c0_6] : memref<4x1x256xf32, #tpu.memory_space<vmem>>, vector<1x1x256xf32>
    %12 = vector.shape_cast %11 : vector<1x1x256xf32> to vector<1x256xf32>
    %13 = vector.shape_cast %10 : vector<1x256xf32> to vector<1x1x256xf32>
    tpu.vector_store %arg5[%c0_4, %c0_5, %c0_6], %13 {strides = array<i32>} : memref<4x1x256xf32, #tpu.memory_space<vmem>>, vector<1x1x256xf32>,
    %c1 = arith.constant 1 : index
    %c0_7 = arith.constant 0 : index
    %c0_8 = arith.constant 0 : index
    %14 = vector.load %arg4[%c1, %c0_7, %c0_8] : memref<4x32x256xf32, #tpu.memory_space<vmem>>, vector<1x32x256xf32>
    %15 = vector.shape_cast %14 : vector<1x32x256xf32> to vector<32x256xf32>
    %cst_9 = arith.constant dense<0.000000e+00> : vector<1x256xf32>
    %16 = tpu.matmul %0, %15, %cst_9 {dimension_numbers = #tpu.dot_dimension_numbers<[1], [0], [0], [1], [0, 0, 1, 1], [], []>} : vector<1x32xf32>, vector<32x256xf32>, vector<1x256xf32> -> vector<1x256xf32>
    %c4_i32_10 = arith.constant 4 : i32
    %17 = arith.muli %arg0, %c4_i32_10 : i32
    %c1_i32 = arith.constant 1 : i32
    %18 = arith.addi %17, %c1_i32 : i32
    %19 = arith.index_cast %18 : i32 to index
    %20 = memref.load %arg2[%19] : memref<4xf32, #tpu.memory_space<smem>>
    %21 = math.exp %16 : vector<1x256xf32>
    %22 = vector.broadcast %20 : f32 to vector<1x256xf32>
    %23 = arith.mulf %21, %22 : vector<1x256xf32>
    %c1_11 = arith.constant 1 : index
    %c0_12 = arith.constant 0 : index
    %c0_13 = arith.constant 0 : index
    %24 = vector.load %arg5[%c1_11, %c0_12, %c0_13] : memref<4x1x256xf32, #tpu.memory_space<vmem>>, vector<1x1x256xf32>
    %25 = vector.shape_cast %24 : vector<1x1x256xf32> to vector<1x256xf32>
    %26 = vector.shape_cast %23 : vector<1x256xf32> to vector<1x1x256xf32>
    tpu.vector_store %arg5[%c1_11, %c0_12, %c0_13], %26 {strides = array<i32>} : memref<4x1x256xf32, #tpu.memory_space<vmem>>, vector<1x1x256xf32>,
    %c2 = arith.constant 2 : index
    %c0_14 = arith.constant 0 : index
    %c0_15 = arith.constant 0 : index
    %27 = vector.load %arg4[%c2, %c0_14, %c0_15] : memref<4x32x256xf32, #tpu.memory_space<vmem>>, vector<1x32x256xf32>
    %28 = vector.shape_cast %27 : vector<1x32x256xf32> to vector<32x256xf32>
    %cst_16 = arith.constant dense<0.000000e+00> : vector<1x256xf32>
    %29 = tpu.matmul %0, %28, %cst_16 {dimension_numbers = #tpu.dot_dimension_numbers<[1], [0], [0], [1], [0, 0, 1, 1], [], []>} : vector<1x32xf32>, vector<32x256xf32>, vector<1x256xf32> -> vector<1x256xf32>
    %c4_i32_17 = arith.constant 4 : i32
    %30 = arith.muli %arg0, %c4_i32_17 : i32
    %c2_i32 = arith.constant 2 : i32
    %31 = arith.addi %30, %c2_i32 : i32
    %32 = arith.index_cast %31 : i32 to index
    %33 = memref.load %arg2[%32] : memref<4xf32, #tpu.memory_space<smem>>
    %34 = math.exp %29 : vector<1x256xf32>
    %35 = vector.broadcast %33 : f32 to vector<1x256xf32>
    %36 = arith.mulf %34, %35 : vector<1x256xf32>
    %c2_18 = arith.constant 2 : index
    %c0_19 = arith.constant 0 : index
    %c0_20 = arith.constant 0 : index
    %37 = vector.load %arg5[%c2_18, %c0_19, %c0_20] : memref<4x1x256xf32, #tpu.memory_space<vmem>>, vector<1x1x256xf32>
    %38 = vector.shape_cast %37 : vector<1x1x256xf32> to vector<1x256xf32>
    %39 = vector.shape_cast %36 : vector<1x256xf32> to vector<1x1x256xf32>
    tpu.vector_store %arg5[%c2_18, %c0_19, %c0_20], %39 {strides = array<i32>} : memref<4x1x256xf32, #tpu.memory_space<vmem>>, vector<1x1x256xf32>,
    %c3 = arith.constant 3 : index
    %c0_21 = arith.constant 0 : index
    %c0_22 = arith.constant 0 : index
    %40 = vector.load %arg4[%c3, %c0_21, %c0_22] : memref<4x32x256xf32, #tpu.memory_space<vmem>>, vector<1x32x256xf32>
    %41 = vector.shape_cast %40 : vector<1x32x256xf32> to vector<32x256xf32>
    %cst_23 = arith.constant dense<0.000000e+00> : vector<1x256xf32>
    %42 = tpu.matmul %0, %41, %cst_23 {dimension_numbers = #tpu.dot_dimension_numbers<[1], [0], [0], [1], [0, 0, 1, 1], [], []>} : vector<1x32xf32>, vector<32x256xf32>, vector<1x256xf32> -> vector<1x256xf32>
    %c4_i32_24 = arith.constant 4 : i32
    %43 = arith.muli %arg0, %c4_i32_24 : i32
    %c3_i32 = arith.constant 3 : i32
    %44 = arith.addi %43, %c3_i32 : i32
    %45 = arith.index_cast %44 : i32 to index
    %46 = memref.load %arg2[%45] : memref<4xf32, #tpu.memory_space<smem>>
    %47 = math.exp %42 : vector<1x256xf32>
    %48 = vector.broadcast %46 : f32 to vector<1x256xf32>
    %49 = arith.mulf %47, %48 : vector<1x256xf32>
    %c3_25 = arith.constant 3 : index
    %c0_26 = arith.constant 0 : index
    %c0_27 = arith.constant 0 : index
    %50 = vector.load %arg5[%c3_25, %c0_26, %c0_27] : memref<4x1x256xf32, #tpu.memory_space<vmem>>, vector<1x1x256xf32>
    %51 = vector.shape_cast %50 : vector<1x1x256xf32> to vector<1x256xf32>
    %52 = vector.shape_cast %49 : vector<1x256xf32> to vector<1x1x256xf32>
    tpu.vector_store %arg5[%c3_25, %c0_26, %c0_27], %52 {strides = array<i32>} : memref<4x1x256xf32, #tpu.memory_space<vmem>>, vector<1x1x256xf32>,
    return
  }
  func.func @transform_0(%arg0: i32, %arg1: i32, %arg2: memref<4xf32, #tpu.memory_space<smem>>) -> (i32, i32) {
    %c0_i32 = arith.constant 0 : i32
    %c0_i32_0 = arith.constant 0 : i32
    %c0_i32_1 = arith.constant 0 : i32
    return %c0_i32, %c0_i32_0 : i32, i32
  }
  func.func @transform_1(%arg0: i32, %arg1: i32, %arg2: memref<4xf32, #tpu.memory_space<smem>>) -> (i32, i32, i32) {
    %c0_i32 = arith.constant 0 : i32
    %c0_i32_0 = arith.constant 0 : i32
    return %arg0, %c0_i32, %arg1 : i32, i32, i32
  }
  func.func @transform_2(%arg0: i32, %arg1: i32, %arg2: memref<4xf32, #tpu.memory_space<smem>>) -> (i32, i32, i32) {
    %c0_i32 = arith.constant 0 : i32
    %c0_i32_0 = arith.constant 0 : i32
    return %arg0, %c0_i32, %arg1 : i32, i32, i32
  }
}

</mosaic_0001>

<bundles_post_ra>
// kernel: _depth_layer_call.1
= control target key start
LH: loop header
LB: loop body
LE: loop exit
PB: predicated region body
PF: predicated region fallthrough
CT: control target
= control target key end

     0   :  { %s762_s0 = inlined_call_operand.vmem [shape: f32[4], index: 0, kind: input, shape index: {}]   ;;  %s763_s1 = inlined_call_operand.hbm [shape: f32[1,32], index: 1, kind: input, shape index: {}]   ;;  %s764_s2 = inlined_call_operand.hbm [shape: f32[4,32,256], index: 2, kind: input, shape index: {}]   ;;  %s765_s3 = inlined_call_operand.hbm [shape: f32[4,1,256], index: 3, kind: output, shape index: {}]  }
   0x1   :  { %s8_s14 = sshll.u32 %s762_s0, 4  ;;  %s9_s14 = int_to_ptr.vmem [resolvable:$true] %s8_s14 }
   0x2   :  { %s571_s15 = scalar_lea.vmem %s9_s14, 16  ;;  %p576_p1 = scmp.lt.s32.totalorder %s9_s14, %s9_s14 }
   0x3   :  { %p572_p0 = scmp.ne.s32.totalorder %s9_s14, %s571_s15  ;;  %p577_p2 = scmp.lt.s32.totalorder %s571_s15, %s571_s15 }
   0x5   :  { %p578_p3 = por %p577_p2, %p576_p1 }
   0x7   :  { %p579_p4 = pnand %p578_p3, %p572_p0 }
   0x9   :  { %582 = shalt.err (!%p579_p4)  }
   0xa   :  { %s657_s16 = smov [#allocation3]  }
   0xb   :  { %11 = dma.vmem_to_smem %s9_s14, 16, %s657_s16, [#allocation2] }
   0xc   :  { %649 = dma.done.wait [#allocation2], 16 }
   0xd   :  { %650 = vsyncadd [#allocation2], 4294967280 }
   0xe   :  { %13 = sfence }
   0xf   :  { %14 = vsyncpa [#allocation5], 0 }
  0x10   :  { %15 = vsyncpa [#allocation8], 0 }
  0x11   :  { %16 = vsyncpa [#allocation6], 0  ;;  %s658_s17 = smov [#allocation4]   ;;  %s659_s19 = smov [#allocation7]  }
  0x12   :  { %s23_s18 = sshll.u32 %s658_s17, 4  ;;  %s32_s0 = sshll.u32 %s659_s19, 4  ;;  %s24_s18 = int_to_ptr.vmem [resolvable:$true] %s23_s18  ;;  %s690_s0 = int_to_ptr.vmem [resolvable:$true] %s32_s0 }
  0x13   :  { %s583_s22 = scalar_lea.hbm %s763_s1, 16 }
  0x14   :  { %p584_p5 = scmp.ne.s32.totalorder %s763_s1, %s583_s22  ;;  %p587_p6 = scmp.lt.u32.totalorder %s583_s22, %s763_s1 }
  0x16   :  { %p589_p7 = pnand %p587_p6, %p584_p5 }
  0x18   :  { %592 = shalt.err (!%p589_p7)
}
  0x19   :  { %s593_s27 = scalar_lea.vmem %s24_s18, 16  ;;  %s597_s28 = scalar_lea.vmem %s24_s18, 32 }
  0x1a   :  { %p594_p8 = scmp.ne.s32.totalorder %s24_s18, %s593_s27  ;;  %p598_p9 = scmp.lt.s32.totalorder %s24_s18, %s24_s18 }
  0x1b   :  { %p599_p10 = scmp.lt.s32.totalorder %s597_s28, %s593_s27 }
  0x1d   :  { %p600_p11 = por %p599_p10, %p598_p9 }
  0x1f   :  { %p601_p12 = pnand %p600_p11, %p594_p8 }
  0x21   :  { %604 = shalt.err (!%p601_p12)
}
  0x22   :  { %26 = dma.hbm_to_vmem [thread:$0]  %s763_s1, 16, %s24_s18, [#allocation5]  }
  0x23   :  { %s605_s6 = scalar_lea.hbm %s764_s2, 4096 }
  0x24   :  { %p606_p13 = scmp.ne.s32.totalorder %s764_s2, %s605_s6  ;;  %p609_p0 = scmp.lt.u32.totalorder %s605_s6, %s764_s2 }
  0x26   :  { %p611_p1 = pnand %p609_p0, %p606_p13 }
  0x28   :  { %614 = shalt.err (!%p611_p1)
}
  0x29   :  { %s615_s11 = scalar_lea.vmem %s690_s0, 4096  ;;  %p620_p3 = scmp.lt.s32.totalorder %s690_s0, %s690_s0 }
  0x2a   :  { %p616_p2 = scmp.ne.s32.totalorder %s690_s0, %s615_s11  ;;  %p621_p4 = scmp.lt.s32.totalorder %s615_s11, %s615_s11 }
  0x2c   :  { %p622_p5 = por %p621_p4, %p620_p3 }
  0x2e   :  { %p623_p6 = pnand %p622_p5, %p616_p2 }
  0x30   :  { %626 = shalt.err (!%p623_p6)
}
  0x31   :  { %s660_s1 = smov 256   ;;  %s661_s12 = smov 16  }
  0x32   :  { %38 = dma.hbm_to_vmem [thread:$0]  %s764_s2, 4096, %s690_s0, [#allocation8], %s660_s1, %s660_s1, %s661_s12  }
  0x33   :  { %651 = dma.done.wait [#allocation5], 16  }
  0x34   :  { %652 = vsyncadd [#allocation5], 4294967280 }
  0x35   :  { %653 = dma.done.wait [#allocation8], 4096  }
  0x36   :  { %654 = vsyncadd [#allocation8], 4294963200  ;;  %v662_v0 = vmov 0.0   ;;  %v47_v1 = vld [vmem:[#allocation7 + $0x8] sm:$0xff]  ;;  %v49_v2 = vld [vmem:[#allocation7 + $0x18] sm:$0xff]  ;;  %vm54_vm0 = vcmask 261120   ;;  %v144_v60 = vlaneseq }
  0x37   :  { %122 = vmatprep.mubr.f32.mxu0 %v662_v0  ;;  %234 = vmatprep.mubr.f32.mxu1 %v662_v0  ;;  %v163_v3 = vld [vmem:[#allocation7 + $0x48] sm:$0xff]  ;;  %v513_v4 = vpack.c.bf16 %v49_v2, %v47_v1  ;;  %v165_v5 = vld [vmem:[#allocation7 + $0x58] sm:$0xff]  ;;  %v46_v6 = vld [vmem:[#allocation7] sm:$0xff]  ;;  %s729_s2 = sld [smem:[#allocation3]]  ;;  %s731_s15 = sld [smem:[#allocation3 + $0x1]] }
  0x38   :  { %v48_v7 = vld [vmem:[#allocation7 + $0x10] sm:$0xff]  ;;  %v521_v8 = vpack.c.bf16 %v165_v5, %v163_v3  ;;  %v162_v10 = vld [vmem:[#allocation7 + $0x40] sm:$0xff]  ;;  %v51_v12 = vld [vmem:[#allocation7 + $0x28] sm:$0xff]  ;;  %v663_v58 = vmov 1966171168   ;;  %s734_s16 = sld [smem:[#allocation3 + $0x2]] }
  0x39   :  { %v515_v9 = vpack.c.bf16 %v48_v7, %v46_v6  ;;  %v164_v11 = vld [vmem:[#allocation7 + $0x50] sm:$0xff]  ;;  %514 = vmatprep.subr.bf16.mxu0 %v513_v4  ;;  %v53_v14 = vld [vmem:[#allocation7 + $0x38] sm:$0xff]  ;;  %v167_v15 = vld [vmem:[#allocation7 + $0x68] sm:$0xff]  ;;  %v142_v59 = vunpack.c.l.s4 %v663_v58  ;;  %s512_s17 = sld [smem:[#allocation3 + $0x3]]  ;;  %vm738_vm1 = vcmp.lt.s32.totalorder %v144_v60, 256  ;;  %s664_s18 = smov [#allocation9]  }
  0x3a   :  { %v523_v13 = vpack.c.bf16 %v164_v11, %v162_v10  ;;  %v169_v16 = vld [vmem:[#allocation7 + $0x78] sm:$0xff]  ;;  %522 = vmatprep.subr.bf16.mxu1 %v521_v8  ;;  %v517_v17 = vpack.c.bf16 %v53_v14, %v51_v12  ;;  %v50_v19 = vld [vmem:[#allocation7 + $0x20] sm:$0xff]  ;;  %v52_v20 = vld [vmem:[#allocation7 + $0x30] sm:$0xff]  ;;  %v145_v8 = vshrl.u32 %v144_v60, 7  ;;  %s493_s19 = sshll.u32 %s664_s18, 4  ;;  %s494_s19 = int_to_ptr.vmem [resolvable:$true] %s493_s19 }
  0x3b   :  { %516 = vmatpush1.bf16.msra.mxu0 %v515_v9  ;;  %v525_v18 = vpack.c.bf16 %v169_v16, %v167_v15  ;;  %v166_v21 = vld [vmem:[#allocation7 + $0x60] sm:$0xff]  ;;  %v519_v22 = vpack.c.bf16 %v52_v20, %v50_v19  ;;  %v168_v23 = vld [vmem:[#allocation7 + $0x70] sm:$0xff]  ;;  %v272_v24 = vld [vmem:[#allocation7 + $0x88] sm:$0xff]  ;;  %v143_v7 = vunpack.c.0.s8 %v142_v59  ;;  %s627_s0 = scalar_lea.vmem %s494_s19, 128  ;;  %p632_p8 = scmp.lt.s32.totalorder %s494_s19, %s494_s19 }
  0x3c   :  { %524 = vmatpush1.bf16.msra.mxu1 %v523_v13  ;;  %518 = vmatprep.subr.bf16.mxu0 %v517_v17  ;;  %v527_v25 = vpack.c.bf16 %v168_v23, %v166_v21  ;;  %v45_v26 = vld [vmem:[#allocation4] sm:$0x1]  ;;  %v381_v28 = vld [vmem:[#allocation7 + $0xc8] sm:$0xff]  ;;  %v271_v32 = vld [vmem:[#allocation7 + $0x80] sm:$0xff]  ;;  %p628_p7 = scmp.ne.s32.totalorder %s494_s19, %s627_s0  ;;  %p633_p9 = scmp.lt.s32.totalorder %s627_s0, %s627_s0 }
  0x3d   :  { %526 = vmatprep.subr.bf16.mxu1 %v525_v18  ;;  %v274_v27 = vld [vmem:[#allocation7 + $0x98] sm:$0xff]  ;;  %v273_v33 = vld [vmem:[#allocation7 + $0x90] sm:$0xff]  ;;  %v380_v34 = vld [vmem:[#allocation7 + $0xc0] sm:$0xff]  ;;  %v135_v4 = vstv %s729_s2  ;;  %v247_v6 = vstv %s731_s15  ;;  %v146_v16 = vsub.s32 %v143_v7, %v145_v8 }
  0x3e   :  { %v383_v29 = vld [vmem:[#allocation7 + $0xd8] sm:$0xff]  ;;  %v529_v30 = vpack.c.bf16 %v274_v27, %v272_v24  ;;  %v531_v35 = vpack.c.bf16 %v273_v33, %v271_v32  ;;  %v382_v36 = vld [vmem:[#allocation7 + $0xd0] sm:$0xff]  ;;  %v276_v37 = vld [vmem:[#allocation7 + $0xa8] sm:$0xff]  ;;  %v356_v20 = vstv %s734_s16  ;;  %p634_p10 = por %p633_p9, %p632_p8 }
  0x3f   :  { %v537_v31 = vpack.c.bf16 %v383_v29, %v381_v28  ;;  %520 = vmatpush1.bf16.msra.mxu0 %v519_v22  ;;  %v278_v38 = vld [vmem:[#allocation7 + $0xb8] sm:$0xff]  ;;  %v539_v39 = vpack.c.bf16 %v382_v36, %v380_v34  ;;  %v385_v41 = vld [vmem:[#allocation7 + $0xe8] sm:$0xff]  ;;  %v275_v43 = vld [vmem:[#allocation7 + $0xa0] sm:$0xff]  ;;  %v465_v22 = vstv %s512_s17 }
  0x40   :  { %528 = vmatpush1.bf16.msra.mxu1 %v527_v25  ;;  %530 = vmatprep.subr.bf16.mxu0 %v529_v30  ;;  %v533_v40 = vpack.c.bf16 %v278_v38, %v276_v37  ;;  %v387_v42 = vld [vmem:[#allocation7 + $0xf8] sm:$0xff]  ;;  %v277_v45 = vld [vmem:[#allocation7 + $0xb0] sm:$0xff]  ;;  %v384_v46 = vld [vmem:[#allocation7 + $0xe0] sm:$0xff]  ;;  %p635_p11 = pnand %p634_p10, %p628_p7 }
  0x41   :  { %538 = vmatprep.subr.bf16.mxu1 %v537_v31  ;;  %v541_v44 = vpack.c.bf16 %v387_v42, %v385_v41  ;;  %v386_v47 = vld [vmem:[#allocation7 + $0xf0] sm:$0xff]  ;;  %v535_v48 = vpack.c.bf16 %v277_v45, %v275_v43 }
  0x42   :  { %506 = vmatmul.mubr.msk.f32.vlgmr.msra.gmra.mrb[0].mxu0 %vm54_vm0, %v45_v26  ;;  %v543_v49 = vpack.c.bf16 %v386_v47, %v384_v46 }
  0x43   :  { %507 = vmatmul.mubr.msk.f32.vlgmr.msra.gmra.mrb[0].mxu1 %vm54_vm0, %v45_v26  ;;  %532 = vmatpush1.bf16.msra.mxu0 %v531_v35 }
  0x44   :  { %540 = vmatpush1.bf16.msra.mxu1 %v539_v39  ;;  %534 = vmatprep.subr.bf16.mxu0 %v533_v40 }
  0x45   :  { %542 = vmatprep.subr.bf16.mxu1 %v541_v44  ;;  %343 = vmatprep.mubr.f32.mxu0 %v662_v0 }
  0x46   :  { %452 = vmatprep.mubr.f32.mxu1 %v662_v0 }
  0x47   :  { %536 = vmatpush1.bf16.msra.mxu0 %v535_v48 }
  0x48   :  { %544 = vmatpush1.bf16.msra.mxu1 %v543_v49 }
  0x4a   :  { %509 = vmatmul.mubr.msk.f32.vlgmr.msra.gmra.mrb[2].mxu0 %vm54_vm0, %v45_v26 }
  0x4b   :  { %511 = vmatmul.mubr.msk.f32.vlgmr.msra.gmra.mrb[2].mxu1 %vm54_vm0, %v45_v26 }
 0x115   :  { %v124_v50 = vpop.f32.mrb[0].mxu0 }
 0x116   :  { %v131_v51 = vmul.f32 1.442695, %v124_v50  ;;  %v236_v52 = vpop.f32.mrb[0].mxu1  ;;  %v126_v53 = vpop.f32.mrb[1].mxu0 }
 0x117   :  { %v243_v54 = vmul.f32 1.442695, %v236_v52  ;;  %v133_v55 = vmul.f32 1.442695, %v126_v53  ;;  %v238_v56 = vpop.f32.mrb[1].mxu1 }
 0x118   :  { %555 = vpow2.f32 %v131_v51  ;;  %v245_v57 = vmul.f32 1.442695, %v238_v56 }
 0x119   :  { %557 = vpow2.f32 %v243_v54 }
 0x11a   :  { %559 = vpow2.f32 %v133_v55 }
 0x11b   :  { %561 = vpow2.f32 %v245_v57 }
 0x11d   :  { %v345_v61 = vpop.f32.mrb[2].mxu0 }
 0x11e   :  { %v352_v62 = vmul.f32 1.442695, %v345_v61  ;;  %v454_v63 = vpop.f32.mrb[2].mxu1  ;;  %v347_v0 = vpop.f32.mrb[3].mxu0 }
 0x11f   :  { %v461_v1 = vmul.f32 1.442695, %v454_v63  ;;  %v354_v2 = vmul.f32 1.442695, %v347_v0  ;;  %v456_v3 = vpop.f32.mrb[3].mxu1 }
 0x120   :  { %563 = vpow2.f32 %v352_v62  ;;  %v463_v5 = vmul.f32 1.442695, %v456_v3 }
 0x121   :  { %565 = vpow2.f32 %v461_v1 }
 0x122   :  { %v556_v9 = vpop.eup %555  ;;  %567 = vpow2.f32 %v354_v2 }
 0x123   :  { %v558_v10 = vpop.eup %557  ;;  %v136_v11 = vmul.f32 %v556_v9, %v135_v4  ;;  %569 = vpow2.f32 %v463_v5 }
 0x124   :  { %v560_v12 = vpop.eup %559  ;;  %v248_v13 = vmul.f32 %v558_v10, %v247_v6 }
 0x125   :  { %v562_v14 = vpop.eup %561  ;;  %v137_v15 = vmul.f32 %v560_v12, %v135_v4 }
 0x126   :  { %v249_v17 = vmul.f32 %v562_v14, %v247_v6 }
 0x127   :  { %v140_v18 = vcombine.low %v136_v11, %v137_v15 }
 0x128   :  { %v252_v19 = vcombine.low %v248_v13, %v249_v17 }
 0x129   :  { %v147_v21 = vrot.slane %v140_v18, %v146_v16 }
 0x12a   :  { %v564_v23 = vpop.eup %563  ;;  %v259_v24 = vrot.slane %v252_v19, %v146_v16 }
 0x12b   :  { %v566_v26 = vpop.eup %565  ;;  %v154_v27 = vrot.slane %v147_v21, %v146_v16  ;;  %v357_v28 = vmul.f32 %v564_v23, %v356_v20 }
 0x12c   :  { %v568_v29 = vpop.eup %567  ;;  %v266_v30 = vrot.slane %v259_v24, %v146_v16  ;;  %v466_v31 = vmul.f32 %v566_v26, %v465_v22 }
 0x12d   :  { %v570_v32 = vpop.eup %569  ;;  %v358_v33 = vmul.f32 %v568_v29, %v356_v20  ;;  %160 = vst.msk [vmem:[#allocation9] sm:$0x3] %vm738_vm1, %v154_v27 }
 0x12e   :  { %v467_v34 = vmul.f32 %v570_v32, %v465_v22  ;;  %269 = vst.msk [vmem:[#allocation9 + $0x2] sm:$0x3] %vm738_vm1, %v266_v30 }
 0x12f   :  { %v361_v35 = vcombine.low %v357_v28, %v358_v33 }
 0x130   :  { %v470_v36 = vcombine.low %v466_v31, %v467_v34 }
 0x131   :  { %v368_v37 = vrot.slane %v361_v35, %v146_v16 }
 0x132   :  { %v477_v38 = vrot.slane %v470_v36, %v146_v16 }
 0x133   :  { %v375_v39 = vrot.slane %v368_v37, %v146_v16 }
 0x134   :  { %v484_v40 = vrot.slane %v477_v38, %v146_v16 }
 0x135   :  { %378 = vst.msk [vmem:[#allocation9 + $0x4] sm:$0x3] %vm738_vm1, %v375_v39 }
 0x136   :  { %487 = vst.msk [vmem:[#allocation9 + $0x6] sm:$0x3] %vm738_vm1, %v484_v40 }
 0x137   :  { %638 = shalt.err (!%p635_p11)
}
 0x138   :  { %s639_s22 = scalar_lea.hbm %s765_s3, 128 }
 0x139   :  { %p640_p12 = scmp.ne.s32.totalorder %s765_s3, %s639_s22  ;;  %p643_p13 = scmp.lt.u32.totalorder %s639_s22, %s765_s3 }
 0x13b   :  { %p645_p0 = pnand %p643_p13, %p640_p12 }
 0x13d   :  { %648 = shalt.err (!%p645_p0)
}
 0x13e   :  { %s665_s27 = smov 32   ;;  %s666_s28 = smov 2  }
 0x13f   :  { %499 = dma.vmem_to_hbm [thread:$0]  %s494_s19, 128, %s765_s3, [#allocation6], %s665_s27, %s665_s27, %s666_s28  }
 0x140   :  { %655 = dma.done.wait [#allocation6], 128  }
 0x141   :  { %656 = vsyncadd [#allocation6], 4294967168 }
 0x142   :  { %503 = vsyncpa [#allocation5], 1 }
 0x143   :  { %504 = vsyncpa [#allocation8], 1 }
 0x144   :  { %505 = vsyncpa [#allocation6], 1 }

</bundles_post_ra>
